<compile_context>
chip_gen: v6e
topology: v6e:2x2x1
jax: 0.10.0
libtpu: 0.0.40
codegen_flags: <defaults>
</compile_context>

<pallas_src>
import math

import jax
import jax.numpy as jnp
from jax.experimental import pallas as pl
from jax.experimental.pallas import tpu as pltpu

LANE = 128      # TPU lane width
SUBLANE = 16    # bf16 sublane packing (rows per vreg); batch tiles stay multiples of this


def _round_up(n, m):
    return ((n + m - 1) // m) * m


def _cdiv(a, b):
    return -(-a // b)


def mlp_kernel(x_ref, w1_ref, b1_ref, w2_ref, b2_ref, w3_ref, b3_ref, o_ref):
    # One batch tile per grid step; weight/bias block indices are constant across the grid so
    # Pallas keeps them VMEM-resident (no re-DMA) while x-load / o-store pipeline vs compute.
    x = x_ref[...].astype(jnp.bfloat16)                                   # f32 stream -> bf16 in-kernel
    h = jnp.dot(x, w1_ref[...], preferred_element_type=jnp.float32) + b1_ref[...]
    h = jnp.maximum(h, 0.0).astype(jnp.bfloat16)                          # ReLU
    h = jnp.dot(h, w2_ref[...], preferred_element_type=jnp.float32) + b2_ref[...]
    h = jnp.tanh(h.astype(jnp.bfloat16))                                  # bf16 tanh (EUP) -> bf16
    o = jnp.dot(h, w3_ref[...], preferred_element_type=jnp.float32) + b3_ref[...]
    o_ref[...] = o.astype(o_ref.dtype)                                    # bf16 (TB, 128) store


def _pick_dimension_semantics():
    """CORE_PARALLEL on v7x (2 TensorCores/chip); plain 'parallel' elsewhere."""
    try:
        kind = jax.devices()[0].device_kind.lower()
    except Exception:
        return ("parallel",)
    if "v7" in kind or "7x" in kind:
        return (pltpu.CORE_PARALLEL,)
    return ("parallel",)


def fully_connected_forward(x_nchw, params, *, tb=1024):
    """x_nchw: (B, C, H, W) float32.  Returns (B, output_size) float32."""
    B = x_nchw.shape[0]
    x2d = x_nchw.reshape(B, -1)                            # nn.Flatten(); stays f32 (single HBM read)
    in_dim = x2d.shape[1]

    w1, b1 = params["w1"], params["b1"]
    w2, b2 = params["w2"], params["b2"]
    w3, b3 = params["w3"], params["b3"]
    out_pad = w3.shape[1]                                  # lane-padded output width (128)
    out_dim = params["out_dim"]                            # true output width (10)

    # Padding policy: pad batch only to a multiple of 16, then split into near-equal
    # 16-aligned tiles of at most `tb` rows.
    B16 = _round_up(max(B, SUBLANE), SUBLANE)
    tb16 = max(_round_up(tb, SUBLANE), SUBLANE)
    ntiles = _cdiv(B16, tb16)
    TB = _round_up(_cdiv(B16, ntiles), SUBLANE)
    Bp = TB * ntiles
    if Bp != B:
        x2d = jnp.pad(x2d, ((0, Bp - B), (0, 0)))
    grid = (ntiles,)

    const2d = lambda i: (0, 0)   # weights/biases: same block every grid step -> stay resident

    wb_bytes = (w1.size + w2.size + w3.size) * 2 + (b1.size + b2.size + b3.size) * 4
    # Double-buffered f32 x tile + double-buffered bf16 out tile + (double-buffered) weights + slack.
    vmem_need = 2 * TB * in_dim * 4 + 2 * TB * out_pad * 2 + 2 * wb_bytes + (4 << 20)
    vmem_limit = int(min(max(vmem_need, 32 << 20), 64 << 20))   # keep headroom on v7x (64 MiB phys)

    flops = 2 * Bp * (in_dim * w1.shape[1] + w1.shape[1] * w2.shape[1] + w2.shape[1] * out_pad)
    bytes_accessed = (Bp * in_dim * 4          # f32 x
                      + wb_bytes               # bf16 weights + f32 biases
                      + Bp * out_pad * 2)      # bf16 output

    def build(dim_sem):
        return pl.pallas_call(
            mlp_kernel,
            out_shape=jax.ShapeDtypeStruct((Bp, out_pad), jnp.bfloat16),
            grid_spec=pltpu.PrefetchScalarGridSpec(
                num_scalar_prefetch=0,
                grid=grid,
                in_specs=[
                    pl.BlockSpec((TB, in_dim), lambda i: (i, 0)),        # streamed batch tile
                    pl.BlockSpec(w1.shape, const2d), pl.BlockSpec(b1.shape, const2d),
                    pl.BlockSpec(w2.shape, const2d), pl.BlockSpec(b2.shape, const2d),
                    pl.BlockSpec(w3.shape, const2d), pl.BlockSpec(b3.shape, const2d),
                ],
                out_specs=pl.BlockSpec((TB, out_pad), lambda i: (i, 0)),
            ),
            compiler_params=pltpu.CompilerParams(
                dimension_semantics=dim_sem,
                vmem_limit_bytes=vmem_limit),
            cost_estimate=pl.CostEstimate(
                flops=flops,
                transcendentals=Bp * w2.shape[1],
                bytes_accessed=bytes_accessed),
        )

    dim_sem = _pick_dimension_semantics()
    try:
        out = jax.block_until_ready(build(dim_sem)(x2d, w1, b1, w2, b2, w3, b3))
    except Exception:
        if dim_sem == ("parallel",):
            raise
        # CORE_PARALLEL not accepted on this chip/runtime -> fall back to plain grid.
        out = jax.block_until_ready(build(("parallel",))(x2d, w1, b1, w2, b2, w3, b3))

    return out[:B, :out_dim].astype(jnp.float32)


def init_params(key, input_size, hidden_layers, output_size):
    """torch.nn.Linear-style U(-1/sqrt(in), 1/sqrt(in)) init.

    Kernel weights are stored transposed to (in, out), zero-padded so every dimension is a
    multiple of 128 (lane-dense), and cast to bf16.  Biases stay f32 and are added to the f32
    MXU accumulator.  Unpadded f32 copies are kept under *_ref keys for the reference check.
    """
    dims = [input_size] + [n for (n, _) in hidden_layers] + [output_size]
    params = {"out_dim": output_size}
    for li in range(len(dims) - 1):
        n_in, n_out = dims[li], dims[li + 1]
        key, kw, kb = jax.random.split(key, 3)
        bound = 1.0 / math.sqrt(n_in)
        w = jax.random.uniform(kw, (n_in, n_out), jnp.float32, -bound, bound)
        b = jax.random.uniform(kb, (1, n_out), jnp.float32, -bound, bound)
        params[f"w{li + 1}_ref"] = w
        params[f"b{li + 1}_ref"] = b
        n_in_p, n_out_p = _round_up(n_in, LANE), _round_up(n_out, LANE)
        w_p = jnp.pad(w, ((0, n_in_p - n_in), (0, n_out_p - n_out)))
        b_p = jnp.pad(b, ((0, 0), (0, n_out_p - n_out)))
        params[f"w{li + 1}"] = w_p.astype(jnp.bfloat16)
        params[f"b{li + 1}"] = b_p                               # f32 bias, added post-accumulate
    return params


if __name__ == "__main__":
    B, C, H, W = 2, 1, 32, 32            # models1x32x32 => 1x32x32 input
    input_size = C * H * W               # 1024
    hidden_layers = [(128, "relu"), (64, "tanh")]
    output_size = 10

    key = jax.random.PRNGKey(0)
    key, kx = jax.random.split(key)
    x = jax.random.normal(kx, (B, C, H, W), jnp.float32)

    params = init_params(key, input_size, hidden_layers, output_size)

    out = fully_connected_forward(x, params)
    jax.block_until_ready(out)

    # Pure-f32 reference with the original (unpadded, unquantized) weights.
    x2d = x.reshape(B, -1)
    ref = jnp.maximum(x2d @ params["w1_ref"] + params["b1_ref"], 0.0)
    ref = jnp.tanh(ref @ params["w2_ref"] + params["b2_ref"])
    ref = ref @ params["w3_ref"] + params["b3_ref"]

    assert out.shape == (B, output_size)
    assert out.dtype == jnp.float32
    # Loose tolerance: kernel runs the matmuls in bf16 (f32 accumulation) with bf16 output store.
    assert jnp.allclose(out, ref, atol=5e-2, rtol=5e-2), float(jnp.max(jnp.abs(out - ref)))

    print("KERNEL_OK")
</pallas_src>

<mosaic_0001>
module attributes {stable_mosaic.version = 11 : i64} {
  func.func @mlp_kernel(%arg0: i32, %arg1: memref<16x1024xf32, #tpu.memory_space<vmem>>, %arg2: memref<1024x128xbf16, #tpu.memory_space<vmem>>, %arg3: memref<1x128xf32, #tpu.memory_space<vmem>>, %arg4: memref<128x128xbf16, #tpu.memory_space<vmem>>, %arg5: memref<1x128xf32, #tpu.memory_space<vmem>>, %arg6: memref<128x128xbf16, #tpu.memory_space<vmem>>, %arg7: memref<1x128xf32, #tpu.memory_space<vmem>>, %arg8: memref<16x128xbf16, #tpu.memory_space<vmem>>) attributes {dimension_semantics = [#tpu.dimension_semantics<parallel>], iteration_bounds = array<i64: 1>, scalar_prefetch = 0 : i64, scratch_operands = 0 : i64, tpu.core_type = #tpu.core_type<tc>, window_params = [{transform_indices = @transform_0, window_bounds = array<i64: 16, 1024>}, {pipeline_mode = #tpu.pipeline_mode<synchronous>, transform_indices = @transform_1, window_bounds = array<i64: 1024, 128>}, {pipeline_mode = #tpu.pipeline_mode<synchronous>, transform_indices = @transform_2, window_bounds = array<i64: 1, 128>}, {pipeline_mode = #tpu.pipeline_mode<synchronous>, transform_indices = @transform_3, window_bounds = array<i64: 128, 128>}, {pipeline_mode = #tpu.pipeline_mode<synchronous>, transform_indices = @transform_4, window_bounds = array<i64: 1, 128>}, {pipeline_mode = #tpu.pipeline_mode<synchronous>, transform_indices = @transform_5, window_bounds = array<i64: 128, 128>}, {pipeline_mode = #tpu.pipeline_mode<synchronous>, transform_indices = @transform_6, window_bounds = array<i64: 1, 128>}, {transform_indices = @transform_7, window_bounds = array<i64: 16, 128>}]} {
    %c0 = arith.constant 0 : index
    %c0_0 = arith.constant 0 : index
    %0 = vector.load %arg1[%c0, %c0_0] : memref<16x1024xf32, #tpu.memory_space<vmem>>, vector<16x1024xf32>
    %1 = arith.truncf %0 : vector<16x1024xf32> to vector<16x1024xbf16>
    %c0_1 = arith.constant 0 : index
    %c0_2 = arith.constant 0 : index
    %2 = vector.load %arg2[%c0_1, %c0_2] : memref<1024x128xbf16, #tpu.memory_space<vmem>>, vector<1024x128xbf16>
    %cst = arith.constant dense<0.000000e+00> : vector<16x128xf32>
    %3 = tpu.matmul %1, %2, %cst {dimension_numbers = #tpu.dot_dimension_numbers<[1], [0], [0], [1], [0, 0, 1, 1], [], []>} : vector<16x1024xbf16>, vector<1024x128xbf16>, vector<16x128xf32> -> vector<16x128xf32>
    %c0_3 = arith.constant 0 : index
    %c0_4 = arith.constant 0 : index
    %4 = vector.load %arg3[%c0_3, %c0_4] : memref<1x128xf32, #tpu.memory_space<vmem>>, vector<1x128xf32>
    %5 = vector.broadcast %4 : vector<1x128xf32> to vector<16x128xf32>
    %6 = arith.addf %3, %5 : vector<16x128xf32>
    %cst_5 = arith.constant 0.000000e+00 : f32
    %7 = vector.broadcast %cst_5 : f32 to vector<16x128xf32>
    %8 = arith.maximumf %6, %7 : vector<16x128xf32>
    %9 = arith.truncf %8 : vector<16x128xf32> to vector<16x128xbf16>
    %c0_6 = arith.constant 0 : index
    %c0_7 = arith.constant 0 : index
    %10 = vector.load %arg4[%c0_6, %c0_7] : memref<128x128xbf16, #tpu.memory_space<vmem>>, vector<128x128xbf16>
    %cst_8 = arith.constant dense<0.000000e+00> : vector<16x128xf32>
    %11 = tpu.matmul %9, %10, %cst_8 {dimension_numbers = #tpu.dot_dimension_numbers<[1], [0], [0], [1], [0, 0, 1, 1], [], []>} : vector<16x128xbf16>, vector<128x128xbf16>, vector<16x128xf32> -> vector<16x128xf32>
    %c0_9 = arith.constant 0 : index
    %c0_10 = arith.constant 0 : index
    %12 = vector.load %arg5[%c0_9, %c0_10] : memref<1x128xf32, #tpu.memory_space<vmem>>, vector<1x128xf32>
    %13 = vector.broadcast %12 : vector<1x128xf32> to vector<16x128xf32>
    %14 = arith.addf %11, %13 : vector<16x128xf32>
    %15 = arith.truncf %14 : vector<16x128xf32> to vector<16x128xbf16>
    %16 = math.tanh %15 : vector<16x128xbf16>
    %c0_11 = arith.constant 0 : index
    %c0_12 = arith.constant 0 : index
    %17 = vector.load %arg6[%c0_11, %c0_12] : memref<128x128xbf16, #tpu.memory_space<vmem>>, vector<128x128xbf16>
    %cst_13 = arith.constant dense<0.000000e+00> : vector<16x128xf32>
    %18 = tpu.matmul %16, %17, %cst_13 {dimension_numbers = #tpu.dot_dimension_numbers<[1], [0], [0], [1], [0, 0, 1, 1], [], []>} : vector<16x128xbf16>, vector<128x128xbf16>, vector<16x128xf32> -> vector<16x128xf32>
    %c0_14 = arith.constant 0 : index
    %c0_15 = arith.constant 0 : index
    %19 = vector.load %arg7[%c0_14, %c0_15] : memref<1x128xf32, #tpu.memory_space<vmem>>, vector<1x128xf32>
    %20 = vector.broadcast %19 : vector<1x128xf32> to vector<16x128xf32>
    %21 = arith.addf %18, %20 : vector<16x128xf32>
    %22 = arith.truncf %21 : vector<16x128xf32> to vector<16x128xbf16>
    %c0_16 = arith.constant 0 : index
    %c0_17 = arith.constant 0 : index
    %23 = vector.load %arg8[%c0_16, %c0_17] : memref<16x128xbf16, #tpu.memory_space<vmem>>, vector<16x128xbf16>
    tpu.vector_store %arg8[%c0_16, %c0_17], %22 {strides = array<i32>} : memref<16x128xbf16, #tpu.memory_space<vmem>>, vector<16x128xbf16>,
    return
  }
  func.func @transform_0(%arg0: i32) -> (i32, i32) {
    %c0_i32 = arith.constant 0 : i32
    %c0_i32_0 = arith.constant 0 : i32
    return %arg0, %c0_i32 : i32, i32
  }
  func.func @transform_1(%arg0: i32) -> (i32, i32) {
    %c0_i32 = arith.constant 0 : i32
    %c0_i32_0 = arith.constant 0 : i32
    %c0_i32_1 = arith.constant 0 : i32
    return %c0_i32, %c0_i32_0 : i32, i32
  }
  func.func @transform_2(%arg0: i32) -> (i32, i32) {
    %c0_i32 = arith.constant 0 : i32
    %c0_i32_0 = arith.constant 0 : i32
    %c0_i32_1 = arith.constant 0 : i32
    return %c0_i32, %c0_i32_0 : i32, i32
  }
  func.func @transform_3(%arg0: i32) -> (i32, i32) {
    %c0_i32 = arith.constant 0 : i32
    %c0_i32_0 = arith.constant 0 : i32
    %c0_i32_1 = arith.constant 0 : i32
    return %c0_i32, %c0_i32_0 : i32, i32
  }
  func.func @transform_4(%arg0: i32) -> (i32, i32) {
    %c0_i32 = arith.constant 0 : i32
    %c0_i32_0 = arith.constant 0 : i32
    %c0_i32_1 = arith.constant 0 : i32
    return %c0_i32, %c0_i32_0 : i32, i32
  }
  func.func @transform_5(%arg0: i32) -> (i32, i32) {
    %c0_i32 = arith.constant 0 : i32
    %c0_i32_0 = arith.constant 0 : i32
    %c0_i32_1 = arith.constant 0 : i32
    return %c0_i32, %c0_i32_0 : i32, i32
  }
  func.func @transform_6(%arg0: i32) -> (i32, i32) {
    %c0_i32 = arith.constant 0 : i32
    %c0_i32_0 = arith.constant 0 : i32
    %c0_i32_1 = arith.constant 0 : i32
    return %c0_i32, %c0_i32_0 : i32, i32
  }
  func.func @transform_7(%arg0: i32) -> (i32, i32) {
    %c0_i32 = arith.constant 0 : i32
    %c0_i32_0 = arith.constant 0 : i32
    return %arg0, %c0_i32 : i32, i32
  }
}

</mosaic_0001>

<bundles_post_ra>
// kernel: tpu_custom_call.1
= control target key start
LH: loop header
LB: loop body
LE: loop exit
PB: predicated region body
PF: predicated region fallthrough
CT: control target
= control target key end

     0   :  { %12 = vsyncpa [#allocation3], 0  ;;  %s1591_s0 = inlined_call_operand.hbm [shape: f32[16,1024], index: 0, kind: input, shape index: {}]   ;;  %s1592_s1 = inlined_call_operand.hbm [shape: bf16[1024,128], index: 1, kind: input, shape index: {}]   ;;  %s1593_s2 = inlined_call_operand.vmem [shape: f32[1,128], index: 2, kind: input, shape index: {}]   ;;  %s1594_s3 = inlined_call_operand.hbm [shape: bf16[128,128], index: 3, kind: input, shape index: {}]   ;;  %s1595_s4 = inlined_call_operand.vmem [shape: f32[1,128], index: 4, kind: input, shape index: {}]   ;;  %s1596_s5 = inlined_call_operand.hbm [shape: bf16[128,128], index: 5, kind: input, shape index: {}]   ;;  %s1597_s6 = inlined_call_operand.vmem [shape: f32[1,128], index: 6, kind: input, shape index: {}]   ;;  %s1598_s7 = inlined_call_operand.hbm [shape: bf16[16,128], index: 7, kind: output, shape index: {}]  }
   0x1   :  { %13 = vsyncpa [#allocation6], 0 }
   0x2   :  { %14 = vsyncpa [#allocation9], 0 }
   0x3   :  { %15 = vsyncpa [#allocation4], 0  ;;  %s1486_s24 = smov [#allocation5]  }
   0x4   :  { %s33_s25 = sshll.u32 %s1486_s24, 4  ;;  %s34_s25 = int_to_ptr.vmem [resolvable:$true] %s33_s25 }
   0x5   :  { %s1386_s26 = scalar_lea.vmem %s34_s25, 8192  ;;  %p1391_p1 = scmp.lt.s32.totalorder %s34_s25, %s34_s25 }
   0x6   :  { %p1387_p0 = scmp.ne.s32.totalorder %s34_s25, %s1386_s26  ;;  %p1392_p2 = scmp.lt.s32.totalorder %s1386_s26, %s1386_s26 }
   0x8   :  { %p1393_p3 = por %p1392_p2, %p1391_p1 }
   0xa   :  { %p1394_p4 = pnand %p1393_p3, %p1387_p0 }
   0xc   :  { %1397 = shalt.err (!%p1394_p4)
}
   0xd   :  { %s1487_s27 = smov 64   ;;  %s1488_s28 = smov 4  }
   0xe   :  { %39 = dma.hbm_to_vmem [thread:$0]  %s1592_s1, 8192, %s34_s25, [#allocation6], %s1487_s27, %s1487_s27, %s1488_s28  }
   0xf   :  { %s1489_s8 = smov [#allocation2]  }
  0x10   :  { %s21_s9 = sshll.u32 %s1489_s8, 4  ;;  %s22_s9 = int_to_ptr.vmem [resolvable:$true] %s21_s9 }
  0x11   :  { %s1406_s10 = scalar_lea.vmem %s22_s9, 2048  ;;  %p1411_p6 = scmp.lt.s32.totalorder %s22_s9, %s22_s9 }
  0x12   :  { %p1407_p5 = scmp.ne.s32.totalorder %s22_s9, %s1406_s10  ;;  %p1412_p7 = scmp.lt.s32.totalorder %s1406_s10, %s1406_s10 }
  0x14   :  { %p1413_p8 = por %p1412_p7, %p1411_p6 }
  0x16   :  { %p1414_p9 = pnand %p1413_p8, %p1407_p5 }
  0x18   :  { %1417 = shalt.err (!%p1414_p9)
}
  0x19   :  { %s1490_s11 = smov 1024   ;;  %s1491_s14 = smov [#allocation7]  }
  0x1a   :  { %27 = dma.hbm_to_vmem [thread:$0]  %s1591_s0, 2048, %s22_s9, [#allocation3], %s1490_s11, %s1490_s11, %s1487_s27  }
  0x1b   :  { %s47_s15 = sshll.u32 %s1491_s14, 4  ;;  %s1492_s1 = smov [#allocation8]   ;;  %s48_s15 = int_to_ptr.vmem [resolvable:$true] %s47_s15 }
  0x1c   :  { %s61_s16 = sshll.u32 %s1492_s1, 4  ;;  %s1426_s17 = scalar_lea.vmem %s48_s15, 1024  ;;  %s62_s16 = int_to_ptr.vmem [resolvable:$true] %s61_s16 }
  0x1d   :  { %p1427_p10 = scmp.ne.s32.totalorder %s48_s15, %s1426_s17  ;;  %p1431_p11 = scmp.lt.s32.totalorder %s48_s15, %s48_s15 }
  0x1e   :  { %p1432_p12 = scmp.lt.s32.totalorder %s1426_s17, %s1426_s17 }
  0x20   :  { %p1433_p13 = por %p1432_p12, %p1431_p11 }
  0x22   :  { %p1434_p0 = pnand %p1433_p13, %p1427_p10 }
  0x24   :  { %1437 = shalt.err (!%p1434_p0)
}
  0x25   :  { %53 = dma.hbm_to_vmem [thread:$0]  %s1594_s3, 1024, %s48_s15, [#allocation6], %s1487_s27, %s1487_s27, %s1488_s28  }
  0x26   :  { %s1446_s0 = scalar_lea.vmem %s62_s16, 1024  ;;  %p1451_p2 = scmp.lt.s32.totalorder %s62_s16, %s62_s16 }
  0x27   :  { %p1447_p1 = scmp.ne.s32.totalorder %s62_s16, %s1446_s0  ;;  %p1452_p3 = scmp.lt.s32.totalorder %s1446_s0, %s1446_s0 }
  0x29   :  { %p1453_p4 = por %p1452_p3, %p1451_p2 }
  0x2b   :  { %p1454_p5 = pnand %p1453_p4, %p1447_p1 }
  0x2d   :  { %1457 = shalt.err (!%p1454_p5)
}
  0x2e   :  { %67 = dma.hbm_to_vmem [thread:$0]  %s1596_s5, 1024, %s62_s16, [#allocation9], %s1487_s27, %s1487_s27, %s1488_s28  }
  0x2f   :  { %1478 = dma.done.wait [#allocation3], 2048  }
  0x30   :  { %1479 = vsyncadd [#allocation3], 4294965248 }
  0x31   :  { %1480 = dma.done.wait [#allocation6], 9216  }
  0x32   :  { %1481 = vsyncadd [#allocation6], 4294958080 }
  0x33   :  { %1482 = dma.done.wait [#allocation9], 1024  }
  0x34   :  { %1483 = vsyncadd [#allocation9], 4294966272  ;;  %v1296_v0 = vld [vmem:[#allocation5 + $0x78] sm:$0xff]   ;;  %v1300_v4 = vld [vmem:[#allocation5 + $0x70] sm:$0xff]   ;;  %vm1494_vm0 = vmmov 0   ;;  %s1495_s25 = smov [#allocation10]  }
  0x35   :  { %v1297_v1 = vld [vmem:[#allocation5 + $0xf8] sm:$0xff]   ;;  %1140 = vmatprep.subr.bf16.mxu0 %v1296_v0  ;;  %v1301_v5 = vld [vmem:[#allocation5 + $0xf0] sm:$0xff]   ;;  %v1304_v8 = vld [vmem:[#allocation5 + $0x68] sm:$0xff]   ;;  %s1034_s26 = sshll.u32 %s1495_s25, 4  ;;  %s1035_s26 = int_to_ptr.vmem [resolvable:$true] %s1034_s26 }
  0x36   :  { %v1298_v2 = vld [vmem:[#allocation5 + $0x38] sm:$0xff]   ;;  %1162 = vmatprep.subr.bf16.mxu1 %v1297_v1  ;;  %v1302_v6 = vld [vmem:[#allocation5 + $0x30] sm:$0xff]   ;;  %v1305_v9 = vld [vmem:[#allocation5 + $0xe8] sm:$0xff]   ;;  %p1463_p7 = scmp.lt.s32.totalorder %s1035_s26, %s1035_s26 }
  0x37   :  { %v1299_v3 = vld [vmem:[#allocation5 + $0xb8] sm:$0xff]   ;;  %1141 = vmatpush3.bf16.msra.mxu0 %v1298_v2  ;;  %v1303_v7 = vld [vmem:[#allocation5 + $0xb0] sm:$0xff]   ;;  %v1306_v10 = vld [vmem:[#allocation5 + $0x28] sm:$0xff]  }
  0x38   :  { %1163 = vmatpush3.bf16.msra.mxu1 %v1299_v3  ;;  %1142 = vmatprep.subr.bf16.mxu0 %v1300_v4  ;;  %v1307_v11 = vld [vmem:[#allocation5 + $0xa8] sm:$0xff]   ;;  %v1308_v12 = vld [vmem:[#allocation5 + $0x60] sm:$0xff]   ;;  %v1312_v16 = vld [vmem:[#allocation5 + $0x58] sm:$0xff]  }
  0x39   :  { %1164 = vmatprep.subr.bf16.mxu1 %v1301_v5  ;;  %v1309_v13 = vld [vmem:[#allocation5 + $0xe0] sm:$0xff]   ;;  %v1313_v17 = vld [vmem:[#allocation5 + $0xd8] sm:$0xff]   ;;  %v1316_v20 = vld [vmem:[#allocation5 + $0x50] sm:$0xff]  }
  0x3a   :  { %v1310_v14 = vld [vmem:[#allocation5 + $0x20] sm:$0xff]   ;;  %v1314_v18 = vld [vmem:[#allocation5 + $0x18] sm:$0xff]   ;;  %v1317_v21 = vld [vmem:[#allocation5 + $0xd0] sm:$0xff]  }
  0x3b   :  { %1143 = vmatpush3.bf16.msra.mxu0 %v1302_v6  ;;  %v1311_v15 = vld [vmem:[#allocation5 + $0xa0] sm:$0xff]   ;;  %v1315_v19 = vld [vmem:[#allocation5 + $0x98] sm:$0xff]   ;;  %v1318_v22 = vld [vmem:[#allocation5 + $0x10] sm:$0xff]  }
  0x3c   :  { %1165 = vmatpush3.bf16.msra.mxu1 %v1303_v7  ;;  %1144 = vmatprep.subr.bf16.mxu0 %v1304_v8  ;;  %v1319_v23 = vld [vmem:[#allocation5 + $0x90] sm:$0xff]   ;;  %v1320_v24 = vld [vmem:[#allocation5 + $0x48] sm:$0xff]   ;;  %v1324_v28 = vld [vmem:[#allocation5 + $0x40] sm:$0xff]  }
  0x3d   :  { %1166 = vmatprep.subr.bf16.mxu1 %v1305_v9  ;;  %v1321_v25 = vld [vmem:[#allocation5 + $0xc8] sm:$0xff]   ;;  %v1325_v29 = vld [vmem:[#allocation5 + $0xc0] sm:$0xff]   ;;  %v86_v34 = vld [vmem:[#allocation2 + $0x18] sm:$0xff] }
  0x3e   :  { %v1322_v26 = vld [vmem:[#allocation5 + $0x8] sm:$0xff]   ;;  %v1326_v30 = vld [vmem:[#allocation5] sm:$0xff]   ;;  %v94_v36 = vld [vmem:[#allocation2 + $0x58] sm:$0xff] }
  0x3f   :  { %1145 = vmatpush3.bf16.msra.mxu0 %v1306_v10  ;;  %v1323_v27 = vld [vmem:[#allocation5 + $0x88] sm:$0xff]   ;;  %v1327_v31 = vld [vmem:[#allocation5 + $0x80] sm:$0xff]   ;;  %v102_v39 = vpack.c.bf16 %v94_v36, %v86_v34  ;;  %v85_v41 = vld [vmem:[#allocation2 + $0x10] sm:$0xff] }
  0x40   :  { %1167 = vmatpush3.bf16.msra.mxu1 %v1307_v11  ;;  %1146 = vmatprep.subr.bf16.mxu0 %v1308_v12  ;;  %v84_v32 = vld [vmem:[#allocation2 + $0x8] sm:$0xff]  ;;  %v83_v37 = vld [vmem:[#allocation2] sm:$0xff]  ;;  %v93_v42 = vld [vmem:[#allocation2 + $0x50] sm:$0xff] }
  0x41   :  { %1168 = vmatprep.subr.bf16.mxu1 %v1309_v13  ;;  %v92_v33 = vld [vmem:[#allocation2 + $0x48] sm:$0xff]  ;;  %v91_v38 = vld [vmem:[#allocation2 + $0x40] sm:$0xff]  ;;  %v101_v43 = vpack.c.bf16 %v93_v42, %v85_v41  ;;  %v1328_v44 = vld [vmem:[#allocation5 + $0x178] sm:$0xff]   ;;  %699 = vmatprep.mubr.bf16.mxu1 %v102_v39 }
  0x42   :  { %v100_v35 = vpack.c.bf16 %v92_v33, %v84_v32  ;;  %v99_v40 = vpack.c.bf16 %v91_v38, %v83_v37  ;;  %v1329_v45 = vld [vmem:[#allocation5 + $0x1f8] sm:$0xff]   ;;  %v1332_v48 = vld [vmem:[#allocation5 + $0x170] sm:$0xff]   ;;  %v1336_v52 = vld [vmem:[#allocation5 + $0x168] sm:$0xff]  }
  0x43   :  { %1147 = vmatpush3.bf16.msra.mxu0 %v1310_v14  ;;  %v1330_v46 = vld [vmem:[#allocation5 + $0x138] sm:$0xff]   ;;  %v1333_v49 = vld [vmem:[#allocation5 + $0x1f0] sm:$0xff]   ;;  %v1337_v53 = vld [vmem:[#allocation5 + $0x1e8] sm:$0xff]  }
  0x44   :  { %1169 = vmatpush3.bf16.msra.mxu1 %v1311_v15  ;;  %1148 = vmatprep.subr.bf16.mxu0 %v1312_v16  ;;  %v1331_v47 = vld [vmem:[#allocation5 + $0x1b8] sm:$0xff]   ;;  %v1334_v50 = vld [vmem:[#allocation5 + $0x130] sm:$0xff]   ;;  %v1338_v54 = vld [vmem:[#allocation5 + $0x128] sm:$0xff]  }
  0x45   :  { %1170 = vmatprep.subr.bf16.mxu1 %v1313_v17  ;;  %658 = vmatprep.mubr.bf16.mxu0 %v100_v35  ;;  %v1335_v51 = vld [vmem:[#allocation5 + $0x1b0] sm:$0xff]   ;;  %v1339_v55 = vld [vmem:[#allocation5 + $0x1a8] sm:$0xff]   ;;  %v1340_v56 = vld [vmem:[#allocation5 + $0x160] sm:$0xff]  }
  0x46   :  { %v1341_v57 = vld [vmem:[#allocation5 + $0x1e0] sm:$0xff]   ;;  %v1344_v60 = vld [vmem:[#allocation5 + $0x158] sm:$0xff]   ;;  %v1348_v0 = vld [vmem:[#allocation5 + $0x150] sm:$0xff]  }
  0x47   :  { %1149 = vmatpush3.bf16.msra.mxu0 %v1314_v18  ;;  %v1342_v58 = vld [vmem:[#allocation5 + $0x120] sm:$0xff]   ;;  %v1345_v61 = vld [vmem:[#allocation5 + $0x1d8] sm:$0xff]   ;;  %v1349_v1 = vld [vmem:[#allocation5 + $0x1d0] sm:$0xff]  }
  0x48   :  { %1171 = vmatpush3.bf16.msra.mxu1 %v1315_v19  ;;  %1150 = vmatprep.subr.bf16.mxu0 %v1316_v20  ;;  %v1343_v59 = vld [vmem:[#allocation5 + $0x1a0] sm:$0xff]   ;;  %v1346_v62 = vld [vmem:[#allocation5 + $0x118] sm:$0xff]   ;;  %v1350_v2 = vld [vmem:[#allocation5 + $0x110] sm:$0xff]  }
  0x49   :  { %1172 = vmatprep.subr.bf16.mxu1 %v1317_v21  ;;  %v1347_v63 = vld [vmem:[#allocation5 + $0x198] sm:$0xff]   ;;  %v1351_v3 = vld [vmem:[#allocation5 + $0x190] sm:$0xff]   ;;  %v1352_v4 = vld [vmem:[#allocation5 + $0x148] sm:$0xff]  }
  0x4a   :  { %v1353_v5 = vld [vmem:[#allocation5 + $0x1c8] sm:$0xff]   ;;  %v1356_v8 = vld [vmem:[#allocation5 + $0x140] sm:$0xff]   ;;  %v90_v14 = vld [vmem:[#allocation2 + $0x38] sm:$0xff] }
  0x4b   :  { %1151 = vmatpush3.bf16.msra.mxu0 %v1318_v22  ;;  %v1354_v6 = vld [vmem:[#allocation5 + $0x108] sm:$0xff]   ;;  %v1357_v9 = vld [vmem:[#allocation5 + $0x1c0] sm:$0xff]   ;;  %v98_v15 = vld [vmem:[#allocation2 + $0x78] sm:$0xff] }
  0x4c   :  { %1173 = vmatpush3.bf16.msra.mxu1 %v1319_v23  ;;  %1152 = vmatprep.subr.bf16.mxu0 %v1320_v24  ;;  %v1355_v7 = vld [vmem:[#allocation5 + $0x188] sm:$0xff]   ;;  %v1358_v10 = vld [vmem:[#allocation5 + $0x100] sm:$0xff]   ;;  %v106_v17 = vpack.c.bf16 %v98_v15, %v90_v14  ;;  %v89_v20 = vld [vmem:[#allocation2 + $0x30] sm:$0xff] }
  0x4d   :  { %1174 = vmatprep.subr.bf16.mxu1 %v1321_v25  ;;  %v1359_v11 = vld [vmem:[#allocation5 + $0x180] sm:$0xff]   ;;  %v88_v12 = vld [vmem:[#allocation2 + $0x28] sm:$0xff]  ;;  %v97_v22 = vld [vmem:[#allocation2 + $0x70] sm:$0xff]  ;;  %v1493_v25 = vmov 0.0  }
  0x4e   :  { %v96_v13 = vld [vmem:[#allocation2 + $0x68] sm:$0xff]  ;;  %v87_v18 = vld [vmem:[#allocation2 + $0x20] sm:$0xff]  ;;  %v105_v23 = vpack.c.bf16 %v97_v22, %v89_v20  ;;  %v1360_v24 = vld [vmem:[#allocation7 + $0x38] sm:$0xff]  }
  0x4f   :  { %1153 = vmatpush3.bf16.msra.mxu0 %v1322_v26  ;;  %v104_v16 = vpack.c.bf16 %v96_v13, %v88_v12  ;;  %v95_v19 = vld [vmem:[#allocation2 + $0x60] sm:$0xff]  ;;  %v1361_v26 = vld [vmem:[#allocation7 + $0x30] sm:$0xff]   ;;  %v1368_v33 = vld [vmem:[#allocation8 + $0x38] sm:$0xff]  }
  0x50   :  { %1175 = vmatpush3.bf16.msra.mxu1 %v1323_v27  ;;  %1154 = vmatprep.subr.bf16.mxu0 %v1324_v28  ;;  %v103_v21 = vpack.c.bf16 %v95_v19, %v87_v18  ;;  %v1362_v27 = vld [vmem:[#allocation7 + $0x28] sm:$0xff]   ;;  %v1363_v28 = vld [vmem:[#allocation7 + $0x20] sm:$0xff]   ;;  %v1369_v34 = vld [vmem:[#allocation8 + $0x30] sm:$0xff]  }
  0x51   :  { %1176 = vmatprep.subr.bf16.mxu1 %v1325_v29  ;;  %v1364_v29 = vld [vmem:[#allocation7 + $0x18] sm:$0xff]   ;;  %v1367_v32 = vld [vmem:[#allocation7] sm:$0xff]  }
  0x52   :  { %v1048_v42 = vld [vmem:[%s1593_s2] ss:$0 sm:$0xff] }
  0x53   :  { %1155 = vmatpush3.bf16.msra.mxu0 %v1326_v30  ;;  %v1365_v30 = vld [vmem:[#allocation7 + $0x10] sm:$0xff]   ;;  %v1375_v12 = vld [vmem:[#allocation8] sm:$0xff]  }
  0x54   :  { %1177 = vmatpush3.bf16.msra.mxu1 %v1327_v31  ;;  %1184 = vmatprep.subr.bf16.mxu0 %v1328_v44  ;;  %v1366_v31 = vld [vmem:[#allocation7 + $0x8] sm:$0xff]   ;;  %v1113_v14 = vld [vmem:[%s1595_s4] ss:$0 sm:$0xff]  ;;  %s1458_s4 = scalar_lea.vmem %s1035_s26, 128 }
  0x55   :  { %1206 = vmatprep.subr.bf16.mxu1 %v1329_v45  ;;  %p1459_p6 = scmp.ne.s32.totalorder %s1035_s26, %s1458_s4  ;;  %p1464_p8 = scmp.lt.s32.totalorder %s1458_s4, %s1458_s4 }
  0x56   :  { %659 = vmatmul.mubr.bf16.vlgmr.msra.gmra.mxu0 %v99_v40 }
  0x57   :  { %700 = vmatmul.mubr.bf16.vlgmr.msra.gmra.mxu1 %v101_v43  ;;  %1185 = vmatpush3.bf16.msra.mxu0 %v1330_v46  ;;  %p1465_p9 = por %p1464_p8, %p1463_p7 }
  0x58   :  { %1207 = vmatpush3.bf16.msra.mxu1 %v1331_v47  ;;  %1186 = vmatprep.subr.bf16.mxu0 %v1332_v48 }
  0x59   :  { %1208 = vmatprep.subr.bf16.mxu1 %v1333_v49  ;;  %740 = vmatprep.mubr.bf16.mxu0 %v104_v16  ;;  %p1466_p10 = pnand %p1465_p9, %p1459_p6 }
  0x5a   :  { %781 = vmatprep.mubr.bf16.mxu1 %v106_v17 }
  0x5b   :  { %1187 = vmatpush3.bf16.msra.mxu0 %v1334_v50 }
  0x5c   :  { %1209 = vmatpush3.bf16.msra.mxu1 %v1335_v51  ;;  %1188 = vmatprep.subr.bf16.mxu0 %v1336_v52 }
  0x5d   :  { %1210 = vmatprep.subr.bf16.mxu1 %v1337_v53 }
  0x5f   :  { %1189 = vmatpush3.bf16.msra.mxu0 %v1338_v54 }
  0x60   :  { %1211 = vmatpush3.bf16.msra.mxu1 %v1339_v55  ;;  %1190 = vmatprep.subr.bf16.mxu0 %v1340_v56 }
  0x61   :  { %1212 = vmatprep.subr.bf16.mxu1 %v1341_v57 }
  0x63   :  { %1191 = vmatpush3.bf16.msra.mxu0 %v1342_v58 }
  0x64   :  { %1213 = vmatpush3.bf16.msra.mxu1 %v1343_v59  ;;  %1192 = vmatprep.subr.bf16.mxu0 %v1344_v60 }
  0x65   :  { %1214 = vmatprep.subr.bf16.mxu1 %v1345_v61 }
  0x67   :  { %1193 = vmatpush3.bf16.msra.mxu0 %v1346_v62 }
  0x68   :  { %1215 = vmatpush3.bf16.msra.mxu1 %v1347_v63  ;;  %1194 = vmatprep.subr.bf16.mxu0 %v1348_v0 }
  0x69   :  { %1216 = vmatprep.subr.bf16.mxu1 %v1349_v1 }
  0x6b   :  { %1195 = vmatpush3.bf16.msra.mxu0 %v1350_v2 }
  0x6c   :  { %1217 = vmatpush3.bf16.msra.mxu1 %v1351_v3  ;;  %1196 = vmatprep.subr.bf16.mxu0 %v1352_v4 }
  0x6d   :  { %1218 = vmatprep.subr.bf16.mxu1 %v1353_v5 }
  0x6f   :  { %1197 = vmatpush3.bf16.msra.mxu0 %v1354_v6 }
  0x70   :  { %1219 = vmatpush3.bf16.msra.mxu1 %v1355_v7  ;;  %1198 = vmatprep.subr.bf16.mxu0 %v1356_v8  ;;  %v1370_v7 = vld [vmem:[#allocation8 + $0x28] sm:$0xff]   ;;  %v1371_v8 = vld [vmem:[#allocation8 + $0x20] sm:$0xff]  }
  0x71   :  { %1220 = vmatprep.subr.bf16.mxu1 %v1357_v9  ;;  %v1372_v9 = vld [vmem:[#allocation8 + $0x18] sm:$0xff]  }
  0x73   :  { %1199 = vmatpush3.bf16.msra.mxu0 %v1358_v10  ;;  %v1373_v10 = vld [vmem:[#allocation8 + $0x10] sm:$0xff]  }
  0x74   :  { %1221 = vmatpush3.bf16.msra.mxu1 %v1359_v11  ;;  %1246 = vmatprep.subr.bf16.mxu0 %v1493_v25  ;;  %v1374_v11 = vld [vmem:[#allocation8 + $0x8] sm:$0xff]  }
  0x75   :  { %1266 = vmatprep.subr.bf16.mxu1 %v1493_v25 }
  0x76   :  { %741 = vmatmul.mubr.bf16.vlgmr.msra.gmra.mxu0 %v103_v21 }
  0x77   :  { %782 = vmatmul.mubr.bf16.vlgmr.msra.gmra.mxu1 %v105_v23  ;;  %1247 = vmatpush3.bf16.msra.mxu0 %v1360_v24  ;;  %v1122_v23 = vld [vmem:[%s1597_s6] ss:$0 sm:$0xff] }
  0x78   :  { %1248 = vmatprep.subr.bf16.mxu0 %v1493_v25  ;;  %1262 = vmatprep.mubr.msk.bf16.mxu0 %vm1494_vm0, %v1493_v25 }
  0x79   :  { %1282 = vmatprep.mubr.msk.bf16.mxu1 %vm1494_vm0, %v1493_v25  ;;  %1267 = vmatpush3.bf16.msra.mxu1 %v1368_v33 }
  0x7a   :  { %1268 = vmatprep.subr.bf16.mxu1 %v1493_v25 }
  0x7b   :  { %1249 = vmatpush3.bf16.msra.mxu0 %v1361_v26 }
  0x7c   :  { %1250 = vmatprep.subr.bf16.mxu0 %v1493_v25 }
  0x7d   :  { %1269 = vmatpush3.bf16.msra.mxu1 %v1369_v34 }
  0x7e   :  { %1270 = vmatprep.subr.bf16.mxu1 %v1493_v25 }
  0x7f   :  { %1251 = vmatpush3.bf16.msra.mxu0 %v1362_v27 }
  0x80   :  { %1252 = vmatprep.subr.bf16.mxu0 %v1493_v25 }
  0x81   :  { %1271 = vmatpush3.bf16.msra.mxu1 %v1370_v7 }
  0x82   :  { %1272 = vmatprep.subr.bf16.mxu1 %v1493_v25 }
  0x83   :  { %1253 = vmatpush3.bf16.msra.mxu0 %v1363_v28 }
  0x84   :  { %1254 = vmatprep.subr.bf16.mxu0 %v1493_v25 }
  0x85   :  { %1273 = vmatpush3.bf16.msra.mxu1 %v1371_v8 }
  0x86   :  { %1274 = vmatprep.subr.bf16.mxu1 %v1493_v25 }
  0x87   :  { %1255 = vmatpush3.bf16.msra.mxu0 %v1364_v29 }
  0x88   :  { %1256 = vmatprep.subr.bf16.mxu0 %v1493_v25 }
  0x89   :  { %1275 = vmatpush3.bf16.msra.mxu1 %v1372_v9 }
  0x8a   :  { %1276 = vmatprep.subr.bf16.mxu1 %v1493_v25 }
  0x8b   :  { %1257 = vmatpush3.bf16.msra.mxu0 %v1365_v30 }
  0x8c   :  { %1258 = vmatprep.subr.bf16.mxu0 %v1493_v25 }
  0x8d   :  { %1277 = vmatpush3.bf16.msra.mxu1 %v1373_v10 }
  0x8e   :  { %1278 = vmatprep.subr.bf16.mxu1 %v1493_v25 }
  0x8f   :  { %1259 = vmatpush3.bf16.msra.mxu0 %v1366_v31 }
  0x90   :  { %1260 = vmatprep.subr.bf16.mxu0 %v1493_v25 }
  0x91   :  { %1279 = vmatpush3.bf16.msra.mxu1 %v1374_v11 }
  0x92   :  { %1280 = vmatprep.subr.bf16.mxu1 %v1493_v25 }
  0x93   :  { %1261 = vmatpush3.bf16.msra.mxu0 %v1367_v32 }
  0x95   :  { %1281 = vmatpush3.bf16.msra.mxu1 %v1375_v12 }
 0x116   :  { %v1156_v35 = vpop.f32.mrf.mxu0 }
 0x117   :  { %v1178_v36 = vpop.f32.mrf.mxu1 }
 0x118   :  { %v1157_v37 = vpop.f32.mrf.mxu0 }
 0x119   :  { %v1179_v38 = vpop.f32.mrf.mxu1  ;;  %v1158_v40 = vadd.f32 %v1157_v37, %v1156_v35 }
 0x11a   :  { %v1159_v39 = vpop.f32.mrf.mxu0  ;;  %v1180_v45 = vadd.f32 %v1179_v38, %v1178_v36 }
 0x11b   :  { %v1181_v41 = vpop.f32.mrf.mxu1  ;;  %v661_v44 = vadd.f32 %v1158_v40, %v1048_v42 }
 0x11c   :  { %v1160_v43 = vpop.f32.mrf.mxu0 }
 0x11d   :  { %v1161_v46 = vadd.f32 %v1160_v43, %v1159_v39  ;;  %v1182_v47 = vpop.f32.mrf.mxu1  ;;  %v702_v51 = vadd.f32 %v1180_v45, %v661_v44 }
 0x11e   :  { %v1183_v56 = vadd.f32 %v1182_v47, %v1181_v41 }
 0x11f   :  { %v664_v52 = vadd.f32 %v1161_v46, %v1048_v42 }
 0x121   :  { %v705_v60 = vadd.f32 %v1183_v56, %v664_v52 }
 0x136   :  { %v1200_v48 = vpop.f32.mrf.mxu0 }
 0x137   :  { %v1222_v49 = vpop.f32.mrf.mxu1 }
 0x138   :  { %v1201_v50 = vpop.f32.mrf.mxu0 }
 0x139   :  { %v1202_v53 = vadd.f32 %v1201_v50, %v1200_v48  ;;  %v1223_v54 = vpop.f32.mrf.mxu1 }
 0x13a   :  { %v1203_v55 = vpop.f32.mrf.mxu0  ;;  %v1224_v61 = vadd.f32 %v1223_v54, %v1222_v49 }
 0x13b   :  { %v743_v57 = vadd.f32 %v1202_v53, %v702_v51  ;;  %v1225_v58 = vpop.f32.mrf.mxu1 }
 0x13c   :  { %v1204_v59 = vpop.f32.mrf.mxu0 }
 0x13d   :  { %v1205_v62 = vadd.f32 %v1204_v59, %v1203_v55  ;;  %v1226_v63 = vpop.f32.mrf.mxu1  ;;  %v784_v0 = vadd.f32 %v1224_v61, %v743_v57 }
 0x13e   :  { %v1227_v2 = vadd.f32 %v1226_v63, %v1225_v58 }
 0x13f   :  { %v746_v1 = vadd.f32 %v1205_v62, %v705_v60  ;;  %v790_v4 = vmax.f32 %v784_v0, 0.0 }
 0x141   :  { %v787_v3 = vadd.f32 %v1227_v2, %v746_v1 }
 0x143   :  { %v791_v5 = vmax.f32 %v787_v3, 0.0 }
 0x145   :  { %v792_v6 = vpack.c.bf16 %v791_v5, %v790_v4 }
 0x147   :  { %1263 = vmatmul.mubr.bf16.vlgmr.msra.gmra.mxu0 %v792_v6 }
 0x207   :  { %v898_v13 = vpop.f32.mrf.mxu0 }
 0x208   :  { %v899_v17 = vadd.f32 %v1113_v14, %v898_v13 }
 0x209   :  { %v1264_v15 = vpop.f32.mrf.mxu0 }
 0x20b   :  { %v901_v16 = vpop.f32.mrf.mxu0 }
 0x20c   :  { %v902_v18 = vadd.f32 %v1113_v14, %v901_v16 }
 0x20d   :  { %v1265_v19 = vpop.f32.mrf.mxu0 }
 0x20e   :  { %v905_v20 = vpack.c.bf16 %v902_v18, %v899_v17 }
 0x210   :  { %1376 = vtanh.bf16 %v905_v20 }
 0x21e   :  { %v1377_v21 = vpop.eup %1376 }
 0x21f   :  { %1283 = vmatmul.mubr.bf16.vlgmr.msra.gmra.mxu1 %v1377_v21 }
 0x2df   :  { %v1012_v22 = vpop.f32.mrf.mxu1 }
 0x2e0   :  { %v1013_v26 = vadd.f32 %v1122_v23, %v1012_v22 }
 0x2e1   :  { %v1284_v24 = vpop.f32.mrf.mxu1 }
 0x2e3   :  { %v1015_v25 = vpop.f32.mrf.mxu1 }
 0x2e4   :  { %v1016_v27 = vadd.f32 %v1122_v23, %v1015_v25 }
 0x2e5   :  { %v1285_v28 = vpop.f32.mrf.mxu1 }
 0x2e6   :  { %v1138_v29 = vpack.c.bf16 %v1016_v27, %v1013_v26 }
 0x2e8   :  { %1139 = vst [vmem:[#allocation10] sm:$0xff] %v1138_v29  }
 0x2e9   :  { %1469 = shalt.err (!%p1466_p10)
}
 0x2ea   :  { %1040 = dma.vmem_to_hbm [thread:$0]  %s1035_s26, 128, %s1598_s7, [#allocation4], %s1487_s27, %s1487_s27, %s1488_s28  }
 0x2eb   :  { %1484 = dma.done.wait [#allocation4], 128  }
 0x2ec   :  { %1485 = vsyncadd [#allocation4], 4294967168 }
 0x2ed   :  { %1044 = vsyncpa [#allocation3], 1 }
 0x2ee   :  { %1045 = vsyncpa [#allocation6], 1 }
 0x2ef   :  { %1046 = vsyncpa [#allocation9], 1 }
 0x2f0   :  { %1047 = vsyncpa [#allocation4], 1 }

</bundles_post_ra>
